<compile_context>
chip_gen: v7x
topology: tpu7x:2x2x1
jax: 0.10.0
libtpu: 0.0.40
codegen_flags: <defaults>
</compile_context>

<pallas_src>
import functools

import jax
import jax.numpy as jnp
from jax.experimental import pallas as pl
from jax.experimental.pallas import tpu as pltpu


def _conv1x1_kernel(x_ref, w_ref, b_ref, o_ref):
    # x_ref: (Cin, tm)   lane-dense spatial tile (spatial on lanes)
    # w_ref: (Cout, Cin) full weight matrix (resident across grid)
    # b_ref: (Cout, 1)   bias column (broadcast over lanes)
    # o_ref: (Cout, tm)  lane-dense output tile
    acc = jnp.dot(w_ref[...], x_ref[...], preferred_element_type=jnp.float32)
    acc = acc + b_ref[...].astype(jnp.float32)
    o_ref[...] = acc.astype(o_ref.dtype)


@functools.partial(jax.jit, static_argnames=("tm",))
def out_forward(x_nchw, weight, bias, *, tm=2048):
    """Forward pass of Out (1x1 conv with bias).

    x_nchw: (N, Cin, H, W)
    weight: (Cout, Cin, 1, 1)  -- same shape convention as nn.Conv2d
    bias:   (Cout,)
    returns (N, Cout, H, W)
    """
    N, Cin, H, W = x_nchw.shape
    Cout = weight.shape[0]
    HW = H * W

    # NCHW -> (N, Cin, H*W) is a free reshape: spatial ends up on the lane axis.
    x3 = x_nchw.reshape(N, Cin, HW)
    w_mat = weight.reshape(Cout, Cin)   # (Cout, Cin)
    b_col = bias.reshape(Cout, 1)       # (Cout, 1), broadcasts over lanes

    # Spatial tile: full row if it fits, otherwise a /128-sized tile (tm).
    # Ragged last block (HW % tm_eff != 0) is fine: out-of-bounds output
    # columns are masked on store and nothing reduces over the spatial axis.
    tm_eff = HW if HW <= tm else tm

    grid = (N, pl.cdiv(HW, tm_eff))

    y3 = pl.pallas_call(
        _conv1x1_kernel,
        out_shape=jax.ShapeDtypeStruct((N, Cout, HW), x_nchw.dtype),
        grid_spec=pltpu.PrefetchScalarGridSpec(
            num_scalar_prefetch=0,
            grid=grid,
            in_specs=[
                # x: one batch image, full channels, one lane-dense spatial tile
                pl.BlockSpec((None, Cin, tm_eff), lambda n, j: (n, 0, j)),
                # weight / bias: full, constant across the grid (stay resident)
                pl.BlockSpec((Cout, Cin), lambda n, j: (0, 0)),
                pl.BlockSpec((Cout, 1), lambda n, j: (0, 0)),
            ],
            out_specs=pl.BlockSpec((None, Cout, tm_eff), lambda n, j: (n, 0, j)),
        ),
        compiler_params=pltpu.CompilerParams(
            dimension_semantics=("parallel", "parallel"),
        ),
    )(x3, w_mat, b_col)

    # (N, Cout, H*W) -> (N, Cout, H, W): free reshape, already NCHW.
    return y3.reshape(N, Cout, H, W)


def init_params(key, in_channels, out_channels, dtype=jnp.float32):
    """Deterministic synthetic init matching nn.Conv2d parameter shapes."""
    kw, kb = jax.random.split(key)
    fan_in = in_channels * 1 * 1
    bound = 1.0 / jnp.sqrt(fan_in)
    weight = jax.random.uniform(
        kw, (out_channels, in_channels, 1, 1), dtype, minval=-bound, maxval=bound
    )
    bias = jax.random.uniform(
        kb, (out_channels,), dtype, minval=-bound, maxval=bound
    )
    return weight, bias


if __name__ == "__main__":
    key = jax.random.PRNGKey(0)
    k_x, k_p = jax.random.split(key)

    # Small shapes consistent with the module: batch=2, in_ch=4, out_ch=8, 16x16.
    N, Cin, Cout, H, W = 2, 4, 8, 16, 16
    x = jax.random.normal(k_x, (N, Cin, H, W), jnp.float32)
    weight, bias = init_params(k_p, Cin, Cout)

    y = out_forward(x, weight, bias)
    y = jax.block_until_ready(y)

    # Reference check in plain JAX (1x1 conv == channel matmul + bias).
    y_ref = (
        jnp.einsum("nchw,oc->nohw", x, weight.reshape(Cout, Cin))
        + bias[None, :, None, None]
    )
    assert y.shape == (N, Cout, H, W)
    assert jnp.allclose(y, y_ref, atol=1e-5, rtol=1e-5)

    print("KERNEL_OK")
</pallas_src>

<mosaic_0001>
module attributes {stable_mosaic.version = 11 : i64} {
  func.func @_conv1x1_kernel(%arg0: i32, %arg1: i32, %arg2: memref<1x4x256xf32, #tpu.memory_space<vmem>>, %arg3: memref<8x4xf32, #tpu.memory_space<vmem>>, %arg4: memref<8x1xf32, #tpu.memory_space<vmem>>, %arg5: memref<1x8x256xf32, #tpu.memory_space<vmem>>) attributes {dimension_semantics = [#tpu.dimension_semantics<parallel>, #tpu.dimension_semantics<parallel>], iteration_bounds = array<i64: 2, 1>, scalar_prefetch = 0 : i64, scratch_operands = 0 : i64, tpu.core_type = #tpu.core_type<tc>, window_params = [{transform_indices = @transform_0, window_bounds = array<i64: 1, 4, 256>}, {pipeline_mode = #tpu.pipeline_mode<synchronous>, transform_indices = @transform_1, window_bounds = array<i64: 8, 4>}, {pipeline_mode = #tpu.pipeline_mode<synchronous>, transform_indices = @transform_2, window_bounds = array<i64: 8, 1>}, {transform_indices = @transform_3, window_bounds = array<i64: 1, 8, 256>}]} {
    %c0 = arith.constant 0 : index
    %c0_0 = arith.constant 0 : index
    %0 = vector.load %arg3[%c0, %c0_0] : memref<8x4xf32, #tpu.memory_space<vmem>>, vector<8x4xf32>
    %c0_1 = arith.constant 0 : index
    %c0_2 = arith.constant 0 : index
    %c0_3 = arith.constant 0 : index
    %1 = vector.load %arg2[%c0_1, %c0_2, %c0_3] : memref<1x4x256xf32, #tpu.memory_space<vmem>>, vector<1x4x256xf32>
    %2 = vector.shape_cast %1 : vector<1x4x256xf32> to vector<4x256xf32>
    %cst = arith.constant dense<0.000000e+00> : vector<8x256xf32>
    %3 = tpu.matmul %0, %2, %cst {dimension_numbers = #tpu.dot_dimension_numbers<[1], [0], [0], [1], [0, 0, 1, 1], [], []>} : vector<8x4xf32>, vector<4x256xf32>, vector<8x256xf32> -> vector<8x256xf32>
    %c0_4 = arith.constant 0 : index
    %c0_5 = arith.constant 0 : index
    %4 = vector.load %arg4[%c0_4, %c0_5] : memref<8x1xf32, #tpu.memory_space<vmem>>, vector<8x1xf32>
    %5 = vector.broadcast %4 : vector<8x1xf32> to vector<8x256xf32>
    %6 = arith.addf %3, %5 : vector<8x256xf32>
    %c0_6 = arith.constant 0 : index
    %c0_7 = arith.constant 0 : index
    %c0_8 = arith.constant 0 : index
    %7 = vector.load %arg5[%c0_6, %c0_7, %c0_8] : memref<1x8x256xf32, #tpu.memory_space<vmem>>, vector<1x8x256xf32>
    %8 = vector.shape_cast %7 : vector<1x8x256xf32> to vector<8x256xf32>
    %9 = vector.shape_cast %6 : vector<8x256xf32> to vector<1x8x256xf32>
    tpu.vector_store %arg5[%c0_6, %c0_7, %c0_8], %9 {strides = array<i32>} : memref<1x8x256xf32, #tpu.memory_space<vmem>>, vector<1x8x256xf32>,
    return
  }
  func.func @transform_0(%arg0: i32, %arg1: i32) -> (i32, i32, i32) {
    %c0_i32 = arith.constant 0 : i32
    %c0_i32_0 = arith.constant 0 : i32
    return %arg0, %c0_i32, %arg1 : i32, i32, i32
  }
  func.func @transform_1(%arg0: i32, %arg1: i32) -> (i32, i32) {
    %c0_i32 = arith.constant 0 : i32
    %c0_i32_0 = arith.constant 0 : i32
    %c0_i32_1 = arith.constant 0 : i32
    return %c0_i32, %c0_i32_0 : i32, i32
  }
  func.func @transform_2(%arg0: i32, %arg1: i32) -> (i32, i32) {
    %c0_i32 = arith.constant 0 : i32
    %c0_i32_0 = arith.constant 0 : i32
    %c0_i32_1 = arith.constant 0 : i32
    return %c0_i32, %c0_i32_0 : i32, i32
  }
  func.func @transform_3(%arg0: i32, %arg1: i32) -> (i32, i32, i32) {
    %c0_i32 = arith.constant 0 : i32
    %c0_i32_0 = arith.constant 0 : i32
    return %arg0, %c0_i32, %arg1 : i32, i32, i32
  }
}

</mosaic_0001>

<bundles_post_ra>
// kernel: out_forward.1
= control target key start
LH: loop header
LB: loop body
LE: loop exit
PB: predicated region body
PF: predicated region fallthrough
CT: control target
= control target key end

     0   :  { %s479_s12 = smov 0   ;;  %s481_s13 = smov 0   ;;  %s518_s0 = inlined_call_operand.vmem [shape: f32[2,4,256], index: 0, kind: input, shape index: {}]   ;;  %s519_s1 = inlined_call_operand.vmem [shape: f32[8,4], index: 1, kind: input, shape index: {}]   ;;  %s520_s2 = inlined_call_operand.vmem [shape: f32[8,1], index: 2, kind: input, shape index: {}]   ;;  %s521_s3 = inlined_call_operand.vmem [shape: f32[2,8,256], index: 3, kind: output, shape index: {}]  }
   0x1   :  { %s483_s14 = smov 0  }
   0x2 LB: > { %s25_s15 = sadd.s32 1, %s451_s13  ;;  %p393_p0 = scmp.ge.s32.totalorder %s455_s14, 1  ;;  %s455_s14 = sphi %s483_s14, %s13_s14   ;;  %s451_s13 = sphi %s481_s13, %s523_s13   ;;  %s447_s12 = sphi %s479_s12, %s522_s12  }
   0x3   : > { %p27_p1 = scmp.ge.s32.totalorder %s25_s15, 2  ;;  %p158_p2 = scmp.lt.s32.totalorder %s455_s14, 3 }
   0x5   : > { %s525_s15 = smov (%p27_p1, %s25_s15), 0  ;;  %p159_p3 = pnand %p393_p0, %p158_p2 }
   0x6   : > { %p191_p4 = scmp.lt.s32.totalorder (!%p159_p3), %s447_s12, 1  ;;  %v457_v0 = vmov (!%p159_p3), 0.0   ;;  %v458_v1 = vmov (!%p159_p3), 0   ;;  %v212_v2 = vld [vmem:[%s520_s2] sm:$0xff] (!%p159_p3)  ;;  %vm224_vm0 = vcmask (!%p159_p3), 1043456   ;;  %vm220_vm1 = vcmask (!%p159_p3), 31744  }
   0x7   : > { %162 = sbr.rel (%p159_p3) target bundleno = 238 (0xee), region = 32  ;;  %293 = vmatprep.mubr.f32.mxu0 (!%p159_p3), %v457_v0  ;;  %431 = vset.pattern.permute.xlu0 (!%p159_p3), %v458_v1  ;;  %v210_v5 = vld [vmem:[%s519_s1] sm:$0xff] (!%p159_p3) }
   0x8   : > { %215 = vperm.xlu0 (!%p159_p3), %431, %v212_v2  }
   0xe   : > { %s527_s12 = smov (!%p191_p4, %s447_s12), 1 }
   0xf   : > { %s403_s18 = sshll.u32 %s527_s12, 3  ;;  %s404_s24 = sshll.u32 %s527_s12, 4 }
  0x10   : > { %s198_s21 = scalar_lea.vmem %s518_s0, %s403_s18  ;;  %s208_s27 = scalar_lea.vmem %s521_s3, %s404_s24 }
  0x11   : > { %v211_v3 = vld [vmem:[%s198_s21] sm:$0xff] }
  0x12   : > { %v219_v4 = vcombine.high %v211_v3, %v211_v3 }
  0x14   : > { %398 = vmatprep.subr.msk.mxu0 %vm224_vm0, %v219_v4 }
  0x15   : > { %399 = vmatpush1.msk.msra.mxu0 %vm224_vm0, %v211_v3 }
  0x16   : > { %400 = vmatmul.mubr.msk.f32.vlgmr.msra.gmra.mrb[0].mxu0 %vm220_vm1, %v210_v5 }
  0x87   : > { %v216_v6 = vpop.permute.xlu0 %215 }
  0xe9   : > { %v295_v7 = vpop.f32.mrb[0].mxu0 }
  0xea   : > { %v296_v8 = vadd.f32 %v295_v7, %v216_v6  ;;  %v297_v9 = vpop.f32.mrb[1].mxu0 }
  0xeb   : > { %v298_v10 = vadd.f32 %v297_v9, %v216_v6 }
  0xec   : > { %300 = vst [vmem:[%s208_s27] sm:$0xff] %v296_v8 }
  0xed   : > { %301 = vst [vmem:[%s208_s27 + $0x8] sm:$0xff] %v298_v10 }
  0xee PF: > { %s13_s14 = sadd.s32 1, %s455_s14   ;;  %s522_s12 = smov %s451_s13 }
  0xef   : > { %p10_p5 = scmp.ge.s32.totalorder %s13_s14, 4   ;;  %s523_s13 = smov %s525_s15 }
  0xf1   :  { %12 = sbr.rel (!%p10_p5) target bundleno = 2 (0x2), region = 62 }

</bundles_post_ra>
